<compile_context>
chip_gen: v7x
topology: tpu7x:2x2x1
jax: 0.10.0
libtpu: 0.0.40
codegen_flags: <defaults>
</compile_context>

<pallas_src>
import functools

import jax
import jax.numpy as jnp
import numpy as np
from jax.experimental import pallas as pl
from jax.experimental.pallas import tpu as pltpu

LANE = 128


def _round_up(x, m):
    return (x + m - 1) // m * m


def _vmem_capacity_bytes():
    """Best-effort physical VMEM capacity query (per TensorCore)."""
    try:
        info = pltpu.get_tpu_info()
        for attr in ("vmem_capacity_bytes", "vmem_bytes", "vmem_size_bytes"):
            v = getattr(info, attr, None)
            if v:
                return int(v)
    except Exception:
        pass
    return 64 << 20  # conservative (v7x-class) if the query is unavailable


def _plan_layer(n_pad, cout_p, r_dim, vmem_cap):
    """Pick (row_tile, xw_resident, vmem_need_bytes) from a per-gen budget."""
    # Scoped-VMEM budget with headroom for compiler scratch / semaphores.
    if vmem_cap <= (64 << 20) + (1 << 20):          # v7x-class: 64 MiB per TC
        budget = min(50 << 20, vmem_cap - (12 << 20))
    else:                                           # v5e / v6e: 128 MiB
        budget = min(100 << 20, vmem_cap - (24 << 20))
    budget = max(budget, 24 << 20)

    xw_resident_bytes = 2 * r_dim * n_pad * cout_p * 2   # conservative (2 bufs)
    xw_stream_bytes = 2 * n_pad * cout_p * 2             # one XW_r, double-buffered
    slack = 2 << 20

    def footprint(tm, resident):
        b = 2 * tm * n_pad * 2                 # A row slab, bf16, double-buffered
        b += xw_resident_bytes if resident else xw_stream_bytes
        b += 2 * tm * cout_p * 4               # init stream (f32), double-buffered
        b += 2 * tm * cout_p * 4               # output tile (<= f32), double-buffered
        b += tm * cout_p * 4                   # f32 accumulator scratch
        return b + slack

    # Row-tile candidates: divide n_pad; keep >= 2 row tiles when possible so
    # the 'parallel' axis splits across v7x's two TensorCores.
    cands = [t for t in (2048, 1024, 512, 256, 128)
             if t <= n_pad and n_pad % t == 0 and t <= max(128, n_pad // 2)]
    if not cands:
        cands = [128]

    # Prefer resident XW (removes all redundant XW HBM traffic) at the largest
    # TM that fits; otherwise stream XW per relation at the largest TM.
    for resident in (True, False):
        for tm in cands:
            if footprint(tm, resident) <= budget:
                return tm, resident, footprint(tm, resident)

    # TODO(synk): dense adjacency too large even at TM=128 -- switch to the
    # sparse edge-list formulation for such graphs.
    tm = cands[-1]
    return tm, False, footprint(tm, False)


# ----------------------------------------------------------------------------
# Pallas kernel: one RGCN layer,  out = (x @ root + bias) + sum_r A_r @ XW_r
# ----------------------------------------------------------------------------
def _rgcn_layer_kernel(init_ref, a_ref, xw_ref, o_ref, acc_ref, *,
                       num_relations, apply_relu, xw_resident):
    r = pl.program_id(1)

    # First relation step for this row tile: seed the f32 accumulator with the
    # precomputed self/root + bias term.
    @pl.when(r == 0)
    def _():
        acc_ref[...] = init_ref[...]

    # Relation-r neighbour contribution: A_r[row tile, :] @ (x @ W_r).
    # bf16 operands, f32 accumulation.
    if xw_resident:
        xw = xw_ref[r]          # resident (R, N_pad, Cout_p) ref, dynamic r
    else:
        xw = xw_ref[...]        # streamed (N_pad, Cout_p) block
    acc_ref[...] += jnp.dot(a_ref[...], xw, preferred_element_type=jnp.float32)

    # Last relation step: inter-layer ReLU (if any) and lane-dense store.
    @pl.when(r == num_relations - 1)
    def _():
        out = acc_ref[...]
        if apply_relu:
            out = jnp.maximum(out, 0.0)
        o_ref[...] = out.astype(o_ref.dtype)


def rgcn_layer(init, adj, xw, *, apply_relu, out_dtype):
    """One RGCNConv layer on padded operands.

    init: [N_pad, Cout_p]     f32   precomputed x @ root + bias
    adj:  [R, N_pad, N_pad]   bf16  adj[r, i, j] = #edges j->i of relation r
    xw:   [R, N_pad, Cout_p]  bf16  precomputed x @ W_r
    """
    n_pad, cout_p = init.shape
    r_dim = adj.shape[0]

    vmem_cap = _vmem_capacity_bytes()
    tm, xw_resident, need = _plan_layer(n_pad, cout_p, r_dim, vmem_cap)
    vmem_limit = int(min(max(need + (4 << 20), 32 << 20), vmem_cap - (8 << 20)))

    kernel = functools.partial(
        _rgcn_layer_kernel, num_relations=r_dim, apply_relu=apply_relu,
        xw_resident=xw_resident)

    if xw_resident:
        xw_spec = pl.BlockSpec((r_dim, n_pad, cout_p), lambda i, r: (0, 0, 0))
    else:
        xw_spec = pl.BlockSpec((None, n_pad, cout_p), lambda i, r: (r, 0, 0))

    return pl.pallas_call(
        kernel,
        out_shape=jax.ShapeDtypeStruct((n_pad, cout_p), out_dtype),
        grid_spec=pltpu.PrefetchScalarGridSpec(
            num_scalar_prefetch=0,
            grid=(n_pad // tm, r_dim),
            in_specs=[
                pl.BlockSpec((tm, cout_p), lambda i, r: (i, 0)),       # init
                pl.BlockSpec((None, tm, n_pad), lambda i, r: (r, i, 0)),  # A_r rows
                xw_spec,                                               # XW
            ],
            out_specs=pl.BlockSpec((tm, cout_p), lambda i, r: (i, 0)),
            scratch_shapes=[pltpu.VMEM((tm, cout_p), jnp.float32)],
        ),
        compiler_params=pltpu.CompilerParams(
            # Row tiles independent (megacore); relation axis is a reduction.
            dimension_semantics=("parallel", "arbitrary"),
            vmem_limit_bytes=vmem_limit,
        ),
    )(init, adj, xw)


# ----------------------------------------------------------------------------
# KStepRGCN wrapper (parameter setup + K stacked layers)
# ----------------------------------------------------------------------------
def init_kstep_rgcn_params(key, in_channels, out_channels, num_relations,
                           num_bases, K):
    """Deterministic synthetic init of the K RGCNConv layers' parameters."""
    params = []
    cin = in_channels
    for _ in range(K):
        key, k1, k2, k3, k4 = jax.random.split(key, 5)
        scale = 1.0 / np.sqrt(cin)
        basis = jax.random.normal(k1, (num_bases, cin, out_channels), jnp.float32) * scale
        att = jax.random.normal(k2, (num_relations, num_bases), jnp.float32) * scale
        root = jax.random.normal(k3, (cin, out_channels), jnp.float32) * scale
        bias = jax.random.normal(k4, (out_channels,), jnp.float32) * 0.1
        params.append(dict(basis=basis, att=att, root=root, bias=bias))
        cin = out_channels
    return params


def build_relation_adjacency(edge_index, edge_attr, num_nodes, num_relations):
    """A[r, i, j] = number of edges j->i with relation r (edge_norm=None)."""
    src = edge_index[0]
    dst = edge_index[1]
    adj = jnp.zeros((num_relations, num_nodes, num_nodes), jnp.float32)
    adj = adj.at[edge_attr, dst, src].add(1.0)
    return adj


def _check_multiplicity(adj):
    """bf16 adjacency is exact only for integer multiplicities <= 256."""
    try:
        mm = float(jnp.max(adj))
    except Exception:
        return  # traced (inside jit): skip the eager check
    if mm > 256.0:
        raise ValueError(
            "edge multiplicity > 256 is not exactly representable in the bf16 "
            "adjacency stream; keep such graphs in f32.")


def kstep_rgcn_forward(params, x, edge_index, edge_attr, num_relations):
    n = x.shape[0]
    n_pad = _round_up(n, LANE)

    # Dense per-relation adjacency, zero-padded, streamed as bf16
    # (edge multiplicities are small integers -> exact in bf16 up to 256).
    adj = build_relation_adjacency(edge_index, edge_attr, n, num_relations)
    _check_multiplicity(adj)
    adj = jnp.pad(adj, ((0, 0), (0, n_pad - n), (0, n_pad - n)))
    adj = adj.astype(jnp.bfloat16)

    x = jnp.pad(x.astype(jnp.float32), ((0, n_pad - n), (0, 0)))

    K = len(params)
    for i, p in enumerate(params):
        num_bases, cin, cout = p["basis"].shape
        cin_p = _round_up(cin, LANE)
        cout_p = _round_up(cout, LANE)
        if x.shape[1] != cin_p:
            x = jnp.pad(x, ((0, 0), (0, cin_p - x.shape[1])))

        basis_p = jnp.pad(p["basis"],
                          ((0, 0), (0, cin_p - cin), (0, cout_p - cout)))
        root_p = jnp.pad(p["root"], ((0, cin_p - cin), (0, cout_p - cout)))
        bias_p = jnp.pad(p["bias"], ((0, cout_p - cout),)).reshape(1, cout_p)

        # Hoisted self/root term: one large efficient XLA matmul, streamed
        # into the kernel per row tile (keeps every grid step uniform bf16
        # MXU work inside the kernel).
        init = jnp.dot(x, root_p, preferred_element_type=jnp.float32) + bias_p

        # Hoisted per-relation x @ W_r, exploiting the basis decomposition:
        #   XB_b = x @ basis_b ;  XW_r = sum_b att[r, b] * XB_b  (cheap glue)
        xb = jnp.einsum("nc,bcd->bnd", x, basis_p)
        xw = jnp.einsum("rb,bnd->rnd", p["att"], xb).astype(jnp.bfloat16)

        last = (i == K - 1)
        x = rgcn_layer(init, adj, xw, apply_relu=not last,
                       out_dtype=jnp.float32 if last else jnp.bfloat16)

    cout_final = params[-1]["basis"].shape[2]
    return x[:n, :cout_final]


# ----------------------------------------------------------------------------
# Pure-JAX f32 reference (exact PyTorch semantics, for correctness check)
# ----------------------------------------------------------------------------
def kstep_rgcn_reference(params, x, edge_index, edge_attr, num_relations):
    n = x.shape[0]
    adj = build_relation_adjacency(edge_index, edge_attr, n, num_relations)
    K = len(params)
    for i, p in enumerate(params):
        num_bases, cin, cout = p["basis"].shape
        w_rel = jnp.matmul(
            p["att"], p["basis"].reshape(num_bases, cin * cout)
        ).reshape(num_relations, cin, cout)
        out = x @ p["root"] + p["bias"]
        for r in range(num_relations):
            out = out + adj[r] @ (x @ w_rel[r])
        if i != K - 1:
            out = jnp.maximum(out, 0.0)
        x = out
    return x


# ----------------------------------------------------------------------------
if __name__ == "__main__":
    # Small config consistent with KStepRGCN.__init__
    num_nodes = 16
    in_channels = 8
    out_channels = 8
    num_relations = 3
    num_bases = 2
    K = 2
    num_edges = 40

    key = jax.random.PRNGKey(0)
    key, kx, ke, ka, kp = jax.random.split(key, 5)

    x = jax.random.normal(kx, (num_nodes, in_channels), jnp.float32)
    edge_index = jax.random.randint(ke, (2, num_edges), 0, num_nodes, jnp.int32)
    edge_attr = jax.random.randint(ka, (num_edges,), 0, num_relations, jnp.int32)

    params = init_kstep_rgcn_params(
        kp, in_channels, out_channels, num_relations, num_bases, K
    )

    out = kstep_rgcn_forward(params, x, edge_index, edge_attr, num_relations)
    out = jax.block_until_ready(out)

    ref = kstep_rgcn_reference(params, x, edge_index, edge_attr, num_relations)
    # bf16 adjacency / XW / intermediate activations with f32 accumulation
    # -> bf16-appropriate tolerance.
    np.testing.assert_allclose(np.asarray(out), np.asarray(ref),
                               rtol=3e-2, atol=3e-2)

    print("KERNEL_OK")
</pallas_src>

<mosaic_0001>
module attributes {stable_mosaic.version = 11 : i64} {
  func.func @_rgcn_layer_kernel(%arg0: i32, %arg1: i32, %arg2: memref<128x128xf32, #tpu.memory_space<vmem>>, %arg3: memref<1x128x128xbf16, #tpu.memory_space<vmem>>, %arg4: memref<3x128x128xbf16, #tpu.memory_space<vmem>>, %arg5: memref<128x128xbf16, #tpu.memory_space<vmem>>, %arg6: memref<128x128xf32, #tpu.memory_space<vmem>>) attributes {dimension_semantics = [#tpu.dimension_semantics<parallel>, #tpu.dimension_semantics<arbitrary>], iteration_bounds = array<i64: 1, 3>, scalar_prefetch = 0 : i64, scratch_operands = 1 : i64, tpu.core_type = #tpu.core_type<tc>, window_params = [{transform_indices = @transform_0, window_bounds = array<i64: 128, 128>}, {transform_indices = @transform_1, window_bounds = array<i64: 1, 128, 128>}, {pipeline_mode = #tpu.pipeline_mode<synchronous>, transform_indices = @transform_2, window_bounds = array<i64: 3, 128, 128>}, {transform_indices = @transform_3, window_bounds = array<i64: 128, 128>}]} {
    %c0_i32 = arith.constant 0 : i32
    %0 = arith.cmpi eq, %arg1, %c0_i32 : i32
    %1 = arith.extui %0 : i1 to i32
    %c0_i32_0 = arith.constant 0 : i32
    %2 = arith.cmpi ne, %1, %c0_i32_0 : i32
    scf.if %2 {
      %c0_10 = arith.constant 0 : index
      %c0_11 = arith.constant 0 : index
      %15 = vector.load %arg2[%c0_10, %c0_11] : memref<128x128xf32, #tpu.memory_space<vmem>>, vector<128x128xf32>
      %c0_12 = arith.constant 0 : index
      %c0_13 = arith.constant 0 : index
      %16 = vector.load %arg6[%c0_12, %c0_13] : memref<128x128xf32, #tpu.memory_space<vmem>>, vector<128x128xf32>
      tpu.vector_store %arg6[%c0_12, %c0_13], %15 {strides = array<i32>} : memref<128x128xf32, #tpu.memory_space<vmem>>, vector<128x128xf32>,
    } else {
    }
    %3 = arith.index_cast %arg1 : i32 to index
    %c0 = arith.constant 0 : index
    %c0_1 = arith.constant 0 : index
    %4 = vector.load %arg4[%3, %c0, %c0_1] : memref<3x128x128xbf16, #tpu.memory_space<vmem>>, vector<1x128x128xbf16>
    %5 = vector.shape_cast %4 : vector<1x128x128xbf16> to vector<128x128xbf16>
    %c0_2 = arith.constant 0 : index
    %c0_3 = arith.constant 0 : index
    %6 = vector.load %arg6[%c0_2, %c0_3] : memref<128x128xf32, #tpu.memory_space<vmem>>, vector<128x128xf32>
    %c0_4 = arith.constant 0 : index
    %c0_5 = arith.constant 0 : index
    %c0_6 = arith.constant 0 : index
    %7 = vector.load %arg3[%c0_4, %c0_5, %c0_6] : memref<1x128x128xbf16, #tpu.memory_space<vmem>>, vector<1x128x128xbf16>
    %8 = vector.shape_cast %7 : vector<1x128x128xbf16> to vector<128x128xbf16>
    %cst = arith.constant dense<0.000000e+00> : vector<128x128xf32>
    %9 = tpu.matmul %8, %5, %cst {dimension_numbers = #tpu.dot_dimension_numbers<[1], [0], [0], [1], [0, 0, 1, 1], [], []>} : vector<128x128xbf16>, vector<128x128xbf16>, vector<128x128xf32> -> vector<128x128xf32>
    %10 = arith.addf %6, %9 : vector<128x128xf32>
    %c0_7 = arith.constant 0 : index
    %c0_8 = arith.constant 0 : index
    %11 = vector.load %arg6[%c0_7, %c0_8] : memref<128x128xf32, #tpu.memory_space<vmem>>, vector<128x128xf32>
    tpu.vector_store %arg6[%c0_7, %c0_8], %10 {strides = array<i32>} : memref<128x128xf32, #tpu.memory_space<vmem>>, vector<128x128xf32>,
    %c2_i32 = arith.constant 2 : i32
    %12 = arith.cmpi eq, %arg1, %c2_i32 : i32
    %13 = arith.extui %12 : i1 to i32
    %c0_i32_9 = arith.constant 0 : i32
    %14 = arith.cmpi ne, %13, %c0_i32_9 : i32
    scf.if %14 {
      %c0_10 = arith.constant 0 : index
      %c0_11 = arith.constant 0 : index
      %15 = vector.load %arg6[%c0_10, %c0_11] : memref<128x128xf32, #tpu.memory_space<vmem>>, vector<128x128xf32>
      %cst_12 = arith.constant 0.000000e+00 : f32
      %16 = vector.broadcast %cst_12 : f32 to vector<128x128xf32>
      %17 = arith.maximumf %15, %16 : vector<128x128xf32>
      %18 = arith.truncf %17 : vector<128x128xf32> to vector<128x128xbf16>
      %c0_13 = arith.constant 0 : index
      %c0_14 = arith.constant 0 : index
      %19 = vector.load %arg5[%c0_13, %c0_14] : memref<128x128xbf16, #tpu.memory_space<vmem>>, vector<128x128xbf16>
      tpu.vector_store %arg5[%c0_13, %c0_14], %18 {strides = array<i32>} : memref<128x128xbf16, #tpu.memory_space<vmem>>, vector<128x128xbf16>,
    } else {
    }
    return
  }
  func.func @transform_0(%arg0: i32, %arg1: i32) -> (i32, i32) {
    %c0_i32 = arith.constant 0 : i32
    %c0_i32_0 = arith.constant 0 : i32
    return %arg0, %c0_i32 : i32, i32
  }
  func.func @transform_1(%arg0: i32, %arg1: i32) -> (i32, i32, i32) {
    %c0_i32 = arith.constant 0 : i32
    %c0_i32_0 = arith.constant 0 : i32
    return %arg1, %arg0, %c0_i32 : i32, i32, i32
  }
  func.func @transform_2(%arg0: i32, %arg1: i32) -> (i32, i32, i32) {
    %c0_i32 = arith.constant 0 : i32
    %c0_i32_0 = arith.constant 0 : i32
    %c0_i32_1 = arith.constant 0 : i32
    %c0_i32_2 = arith.constant 0 : i32
    return %c0_i32, %c0_i32_0, %c0_i32_1 : i32, i32, i32
  }
  func.func @transform_3(%arg0: i32, %arg1: i32) -> (i32, i32) {
    %c0_i32 = arith.constant 0 : i32
    %c0_i32_0 = arith.constant 0 : i32
    return %arg0, %c0_i32 : i32, i32
  }
}

</mosaic_0001>

<bundles_post_ra>
// kernel: tpu_custom_call.1
= control target key start
LH: loop header
LB: loop body
LE: loop exit
PB: predicated region body
PF: predicated region fallthrough
CT: control target
= control target key end

     0   :  { %8 = vsyncpa [#allocation4], 0  ;;  %s1504_s0 = inlined_call_operand.hbm [shape: f32[128,128], index: 0, kind: input, shape index: {}]   ;;  %s1505_s1 = inlined_call_operand.hbm [shape: bf16[3,128,128], index: 1, kind: input, shape index: {}]   ;;  %s1506_s2 = inlined_call_operand.hbm [shape: bf16[3,128,128], index: 2, kind: input, shape index: {}]   ;;  %s1507_s3 = inlined_call_operand.hbm [shape: bf16[128,128], index: 3, kind: output, shape index: {}]  }
   0x1   :  { %9 = vsyncpa [#allocation7], 0 }
   0x2   :  { %11 = vsyncpa [#allocation7 + $0x1], 0 }
   0x3   :  { %12 = vsyncpa [#allocation5], 0  ;;  %s1260_s12 = smov 0   ;;  %s1262_s13 = smov 0  }
   0x4   :  { %s1264_s14 = smov 0   ;;  %s1266_s15 = smov 0  }
   0x5   :  { %s1268_s16 = smov 0   ;;  %s1270_s17 = smov 0  }
   0x6 LB: > { %s1289_s18 = sadd.s32 4294967295, %s1228_s17   ;;  %p72_p0 = scmp.ne.s32.totalorder %s1216_s14, %s1212_s13  ;;  %s1228_s17 = sphi %s1270_s17, %s18_s17   ;;  %s1224_s16 = sphi %s1268_s16, %s1529_s16   ;;  %s1220_s15 = sphi %s1266_s15, %s1528_s15   ;;  %s1216_s14 = sphi %s1264_s14, %s1527_s14   ;;  %s1212_s13 = sphi %s1262_s13, %s1526_s13   ;;  %s1208_s12 = sphi %s1260_s12, %s1525_s12  }
   0x7   : > { %p73_p1 = scmp.eq.s32.totalorder %s1228_s17, 0  ;;  %p78_p2 = scmp.ne.s32.totalorder %s1212_s13, %s1208_s12 }
   0x8   : > { %p1508_p3 = scmp.eq.s32.totalorder %s1289_s18, 0  ;;  %p769_p4 = scmp.ge.s32.totalorder %s1228_s17, 1 }
   0x9   : > { %p74_p5 = por %p73_p1, %p72_p0  ;;  %p136_p6 = scmp.lt.s32.totalorder %s1228_s17, 4 }
   0xa   : > { %p1300_p7 = por %p1508_p3, %p78_p2  ;;  %s1230_s21 = smov [#allocation8]  }
   0xb   : > { %p1304_p8 = pnand %p769_p4, %p136_p6  ;;  %s164_s22 = sshll.u32 %s1230_s21, 4  ;;  %s165_s22 = int_to_ptr.vmem [resolvable:$true] %s164_s22 }
   0xc   : > { %s1512_s19 = scalar_select %p1300_p7, 1, 0 }
   0xd   : > { %s1513_s20 = scalar_select %p1304_p8, 1, 0 }
   0xe   : > { %p963_p9 = pneg %p1304_p8  ;;  %p976_p11 = scmp.lt.s32.totalorder %s1228_s17, 3 }
   0xf   : > { %s1054_s27 = scalar_lea.hbm %s1506_s2, 3072 }
  0x10   : > { %p1312_p10 = pnand %p963_p9, %p1508_p3  ;;  %p1317_p12 = pnand %p976_p11, %p74_p5 }
  0x11   : > { %p1055_p13 = scmp.ne.s32.totalorder %s1506_s2, %s1054_s27  ;;  %p1061_p4 = scmp.lt.u32.totalorder %s1054_s27, %s1506_s2 }
  0x12   : > { %s1515_s24 = scalar_select %p1317_p12, 1, 0 }
  0x13   : > { %p1056_p0 = pneg %p1312_p10 }
  0x15   : > { %p1057_p1 = pnand %p1056_p0, %p1055_p13 }
  0x17   : > { %p1058_p2 = pneg %p1057_p1 }
  0x19   : > { %p1063_p5 = pnand %p1061_p4, %p1058_p2 }
  0x1b   : > { %1066 = shalt.err (!%p1063_p5)
}
  0x1c   : > { %s1067_s5 = scalar_lea.vmem %s165_s22, 3072  ;;  %p1075_p3 = scmp.lt.s32.totalorder %s165_s22, %s165_s22 }
  0x1d   : > { %p1068_p6 = scmp.ne.s32.totalorder %s165_s22, %s1067_s5  ;;  %p1076_p7 = scmp.lt.s32.totalorder %s1067_s5, %s1067_s5 }
  0x1f   : > { %p1070_p9 = pnand %p1068_p6, %p1056_p0  ;;  %p1077_p8 = por %p1076_p7, %p1075_p3 }
  0x21   : > { %p1071_p11 = pneg %p1070_p9 }
  0x23   : > { %p1078_p12 = pnand %p1077_p8, %p1071_p11 }
  0x25   : > { %1081 = shalt.err (!%p1078_p12)
}
  0x26   : > { %s1231_s6 = smov 64   ;;  %s1232_s7 = smov 4  }
  0x27   : > { %969 = dma.hbm_to_vmem [thread:$0]  (!%p1312_p10), %s1506_s2, 3072, %s165_s22, [#allocation7], %s1231_s6, %s1231_s6, %s1232_s7  }
  0x28   : > { %s1233_s10 = smov [#allocation3]   ;;  %s1082_s25 = scalar_lea.hbm %s1504_s0, 2048 }
  0x29   : > { %s151_s11 = sshll.u32 %s1233_s10, 4  ;;  %p1083_p3 = scmp.ne.s32.totalorder %s1504_s0, %s1082_s25  ;;  %s152_s11 = int_to_ptr.vmem [resolvable:$true] %s151_s11 }
  0x2a   : > { %p1089_p12 = scmp.lt.u32.totalorder %s1082_s25, %s1504_s0 }
  0x2b   : > { %p1085_p7 = pnand %p1083_p3, %p1056_p0 }
  0x2d   : > { %p1086_p8 = pneg %p1085_p7 }
  0x2f   : > { %p1091_p13 = pnand %p1089_p12, %p1086_p8 }
  0x31   : > { %1094 = shalt.err (!%p1091_p13)
}
  0x32   : > { %s1095_s22 = scalar_lea.vmem %s152_s11, 2048  ;;  %p1103_p5 = scmp.lt.s32.totalorder %s152_s11, %s152_s11 }
  0x33   : > { %p1096_p1 = scmp.ne.s32.totalorder %s152_s11, %s1095_s22  ;;  %p1104_p6 = scmp.lt.s32.totalorder %s1095_s22, %s1095_s22 }
  0x35   : > { %p1098_p2 = pnand %p1096_p1, %p1056_p0  ;;  %p1105_p9 = por %p1104_p6, %p1103_p5 }
  0x37   : > { %p1099_p4 = pneg %p1098_p2 }
  0x39   : > { %p1106_p11 = pnand %p1105_p9, %p1099_p4 }
  0x3b   : > { %1109 = shalt.err (!%p1106_p11)
}
  0x3c   : > { %s1234_s30 = smov 128   ;;  %s1235_s4 = smov 8  }
  0x3d   : > { %966 = dma.hbm_to_vmem [thread:$0]  (!%p1312_p10), %s1504_s0, 2048, %s152_s11, [#allocation4], %s1234_s30, %s1234_s30, %s1235_s4  }
  0x3e   : > { %s65_s9 = sadd.s32 1, %s1216_s14  ;;  %s178_s10 = sand.u32 1, %s1228_s17  }
  0x3f   : > { %s27_s12 = sadd.s32 1, %s1224_s16  ;;  %s180_s21 = sand.u32 1, %s1216_s14  }
  0x40   : > { %p28_p0 = scmp.ge.s32.totalorder %s27_s12, 3  ;;  %s773_s25 = sshll.u32 %s180_s21, 6 }
  0x41   : > { %s820_s26 = sshll.u32 %s1224_s16, 10  ;;  %s182_s29 = scalar_lea.vmem [#allocation6], %s773_s25 }
  0x42   : > { %s1531_s12 = smov (%p28_p0, %s27_s12), 0  ;;  %s1376_s23 = scalar_lea.hbm %s1505_s1, %s820_s26 }
  0x43   : > { %s60_s11 = ssub.s32 %s1224_s16, %s1531_s12  ;;  %s191_s22 = sshll.u32 %s182_s29, 4  ;;  %s1384_s22 = int_to_ptr.vmem [resolvable:$true] %s191_s22 }
  0x44   : > { %p1380_p10 = scmp.eq.s32.totalorder %s60_s11, 0  ;;  %s1386_s4 = scalar_lea.sflag [#allocation7], %s178_s10 }
  0x45   : > { %s1110_s5 = scalar_lea.hbm %s1376_s23, 1024  ;;  %p1517_p7 = scmp.ne.s32.totalorder %s1515_s24, 0 }
  0x46   : > { %p1111_p3 = scmp.ne.s32.totalorder %s1376_s23, %s1110_s5  ;;  %s1115_s25 = scalar_lea.hbm %s1505_s1, 3072 }
  0x47   : > { %p1112_p8 = pneg %p1517_p7  ;;  %p1116_p1 = scmp.lt.u32.totalorder %s1376_s23, %s1505_s1 }
  0x48   : > { %p1117_p2 = scmp.lt.u32.totalorder %s1115_s25, %s1110_s5  ;;  %p1119_p5 = scmp.lt.u32.totalorder %s1110_s5, %s1376_s23 }
  0x49   : > { %p1113_p12 = pnand %p1112_p8, %p1111_p3 }
  0x4a   : > { %p1118_p4 = por %p1117_p2, %p1116_p1 }
  0x4b   : > { %p1114_p13 = pneg %p1113_p12 }
  0x4c   : > { %p1120_p6 = por %p1119_p5, %p1118_p4 }
  0x4e   : > { %p1121_p9 = pnand %p1120_p6, %p1114_p13 }
  0x50   : > { %1124 = shalt.err (!%p1121_p9)
}
  0x51   : > { %s1125_s10 = scalar_lea.vmem %s1384_s22, 1024  ;;  %s1236_s28 = smov [#allocation6]  }
  0x52   : > { %p1126_p11 = scmp.ne.s32.totalorder %s1384_s22, %s1125_s10  ;;  %s1130_s11 = sshll.u32 %s1236_s28, 4  ;;  %s1131_s11 = int_to_ptr.vmem [resolvable:$false] %s1130_s11 }
  0x53   : > { %s1132_s29 = scalar_lea.vmem %s1131_s11, 2048  ;;  %p1133_p12 = scmp.lt.s32.totalorder %s1384_s22, %s1131_s11 }
  0x54   : > { %p1128_p0 = pnand %p1126_p11, %p1112_p8  ;;  %p1134_p1 = scmp.lt.s32.totalorder %s1132_s29, %s1125_s10 }
  0x56   : > { %p1129_p3 = pneg %p1128_p0  ;;  %p1135_p2 = por %p1134_p1, %p1133_p12 }
  0x58   : > { %p1136_p4 = pnand %p1135_p2, %p1129_p3 }
  0x5a   : > { %1139 = shalt.err (!%p1136_p4)
}
  0x5b   : > { %973 = dma.hbm_to_vmem [thread:$0]  (!%p1517_p7), %s1376_s23, 1024, %s1384_s22, %s1386_s4, %s1231_s6, %s1231_s6, %s1232_s7  }
  0x5c   : > { %s1422_s5 = scalar_select %p1380_p10, %s1216_s14, %s65_s9  }
  0x5d   : > { %p1518_p8 = scmp.ne.s32.totalorder %s1513_s20, 0 }
  0x5e   : > { %p1519_p13 = scmp.eq.s32.totalorder (!%p1518_p8), %s1289_s18, 0 }
  0x5f   : > { %203 = sbr.rel (%p1518_p8) target bundleno = 421 (0x1a5), region = 32 }
  0x66   : > { %1191 = dma.done.wait (%p1519_p13), [#allocation4], 2048   ;;  %p1520_p5 = pmov %p1519_p13 }
  0x67   : > { %s209_s24 = sand.u32 1, %s1289_s18   ;;  %s211_s8 = sand.u32 1, %s1212_s13  }
  0x68   : > { %1193 = vsyncadd (%p1520_p5), [#allocation4], 4294965248  ;;  %s778_s21 = sshll.u32 %s211_s8, 6  ;;  %s210_s6 = scalar_lea.sflag [#allocation7], %s209_s24 }
  0x69   : > { %s1432_s7 = scalar_lea.vmem [#allocation6], %s778_s21  ;;  %p1521_p10 = scmp.ne.s32.totalorder %s1512_s19, 0 }
  0x6b   : > { %1195 = dma.done.wait (%p1521_p10), %s210_s6, 1024  }
  0x6c   : > { %1197 = vsyncadd (%p1521_p10), %s210_s6, 4294966272  ;;  %p1522_p7 = pmov %p1520_p5 }
  0x6d   : > { %p1523_p6 = pmov %p1520_p5 }
  0x6e   : > { %1199 = dma.done.wait (%p1522_p7), [#allocation7], 3072  }
  0x6f   : > { %1201 = vsyncadd (%p1523_p6), [#allocation7], 4294964224  ;;  %p780_p9 = scmp.ne.s32.totalorder %s1220_s15, 0 }
  0x70   : > { %v243_v0 = vld [vmem:[#allocation3] sm:$0xff] (!%p780_p9)  ;;  %v244_v1 = vld [vmem:[#allocation3 + $0x8] sm:$0xff] (!%p780_p9)  ;;  %v245_v2 = vld [vmem:[#allocation3 + $0x10] sm:$0xff] (!%p780_p9) }
  0x71   : > { %242 = sbr.rel (%p780_p9) target bundleno = 121 (0x79), region = 48  ;;  %259 = vst [vmem:[#allocation2] sm:$0xff] (!%p780_p9), %v243_v0  ;;  %260 = vst [vmem:[#allocation2 + $0x8] sm:$0xff] (!%p780_p9), %v244_v1  ;;  %v246_v3 = vld [vmem:[#allocation3 + $0x18] sm:$0xff] (!%p780_p9)  ;;  %v247_v4 = vld [vmem:[#allocation3 + $0x20] sm:$0xff] (!%p780_p9) }
  0x72   : > { %261 = vst [vmem:[#allocation2 + $0x10] sm:$0xff] (!%p780_p9), %v245_v2  ;;  %v248_v5 = vld [vmem:[#allocation3 + $0x28] sm:$0xff] (!%p780_p9)  ;;  %262 = vst [vmem:[#allocation2 + $0x18] sm:$0xff] (!%p780_p9), %v246_v3  ;;  %v249_v6 = vld [vmem:[#allocation3 + $0x30] sm:$0xff] (!%p780_p9) }
  0x73   : > { %263 = vst [vmem:[#allocation2 + $0x20] sm:$0xff] (!%p780_p9), %v247_v4  ;;  %264 = vst [vmem:[#allocation2 + $0x28] sm:$0xff] (!%p780_p9), %v248_v5  ;;  %v250_v7 = vld [vmem:[#allocation3 + $0x38] sm:$0xff] (!%p780_p9)  ;;  %v251_v8 = vld [vmem:[#allocation3 + $0x40] sm:$0xff] (!%p780_p9) }
  0x74   : > { %265 = vst [vmem:[#allocation2 + $0x30] sm:$0xff] (!%p780_p9), %v249_v6  ;;  %266 = vst [vmem:[#allocation2 + $0x38] sm:$0xff] (!%p780_p9), %v250_v7  ;;  %v252_v9 = vld [vmem:[#allocation3 + $0x48] sm:$0xff] (!%p780_p9)  ;;  %v253_v10 = vld [vmem:[#allocation3 + $0x50] sm:$0xff] (!%p780_p9) }
  0x75   : > { %267 = vst [vmem:[#allocation2 + $0x40] sm:$0xff] (!%p780_p9), %v251_v8  ;;  %v254_v11 = vld [vmem:[#allocation3 + $0x58] sm:$0xff] (!%p780_p9)  ;;  %268 = vst [vmem:[#allocation2 + $0x48] sm:$0xff] (!%p780_p9), %v252_v9  ;;  %v255_v12 = vld [vmem:[#allocation3 + $0x60] sm:$0xff] (!%p780_p9) }
  0x76   : > { %269 = vst [vmem:[#allocation2 + $0x50] sm:$0xff] (!%p780_p9), %v253_v10  ;;  %270 = vst [vmem:[#allocation2 + $0x58] sm:$0xff] (!%p780_p9), %v254_v11  ;;  %v256_v13 = vld [vmem:[#allocation3 + $0x68] sm:$0xff] (!%p780_p9)  ;;  %v257_v14 = vld [vmem:[#allocation3 + $0x70] sm:$0xff] (!%p780_p9) }
  0x77   : > { %271 = vst [vmem:[#allocation2 + $0x60] sm:$0xff] (!%p780_p9), %v255_v12  ;;  %272 = vst [vmem:[#allocation2 + $0x68] sm:$0xff] (!%p780_p9), %v256_v13  ;;  %v258_v15 = vld [vmem:[#allocation3 + $0x78] sm:$0xff] (!%p780_p9) }
  0x78   : > { %273 = vst [vmem:[#allocation2 + $0x70] sm:$0xff] %v257_v14  ;;  %274 = vst [vmem:[#allocation2 + $0x78] sm:$0xff] %v258_v15 }
  0x79 PF: > { %s821_s19 = sshll.u32 %s1220_s15, 6  ;;  %v1046_v16 = vld [vmem:[%s1432_s7] sm:$0xff]   ;;  %v1048_v26 = vld [vmem:[%s1432_s7 + $0x8] sm:$0xff]   ;;  %v1050_v28 = vld [vmem:[%s1432_s7 + $0x10] sm:$0xff]   ;;  %p799_p11 = scmp.ne.s32.totalorder %s1220_s15, 2 }
  0x7a   : > { %v1047_v17 = vld [vmem:[%s1432_s7 + $0x20] sm:$0xff]   ;;  %s1446_s20 = scalar_lea.vmem [#allocation8], %s821_s19  ;;  %917 = vmatprep.mubr.bf16.mxu0 %v1046_v16  ;;  %v1049_v27 = vld [vmem:[%s1432_s7 + $0x28] sm:$0xff]   ;;  %v1051_v29 = vld [vmem:[%s1432_s7 + $0x30] sm:$0xff]  }
  0x7b   : > { %v1038_v18 = vld [vmem:[%s1446_s20] sm:$0xff]   ;;  %v1039_v19 = vld [vmem:[%s1446_s20 + $0x8] sm:$0xff]   ;;  %925 = vmatprep.mubr.bf16.mxu1 %v1047_v17  ;;  %v1040_v20 = vld [vmem:[%s1446_s20 + $0x10] sm:$0xff]  }
  0x7c   : > { %901 = vmatprep.subr.bf16.mxu0 %v1038_v18  ;;  %933 = vmatprep.subr.bf16.mxu1 %v1038_v18  ;;  %v1041_v21 = vld [vmem:[%s1446_s20 + $0x18] sm:$0xff]   ;;  %v1042_v22 = vld [vmem:[%s1446_s20 + $0x20] sm:$0xff]   ;;  %v1043_v23 = vld [vmem:[%s1446_s20 + $0x28] sm:$0xff]  }
  0x7d   : > { %902 = vmatpush3.bf16.msra.mxu0 %v1038_v18  ;;  %941 = vmatpush3.bf16.msra.mxu1 %v1038_v18  ;;  %v1044_v24 = vld [vmem:[%s1446_s20 + $0x30] sm:$0xff]   ;;  %v1045_v25 = vld [vmem:[%s1446_s20 + $0x38] sm:$0xff]   ;;  %v294_v34 = vld [vmem:[#allocation2] sm:$0xff] }
  0x7e   : > { %903 = vmatprep.subr.bf16.mxu0 %v1039_v19  ;;  %934 = vmatprep.subr.bf16.mxu1 %v1039_v19  ;;  %v1052_v30 = vld [vmem:[%s1432_s7 + $0x18] sm:$0xff]   ;;  %v296_v32 = vld [vmem:[#allocation2 + $0x10] sm:$0xff]  ;;  %v302_v35 = vld [vmem:[#allocation2 + $0x40] sm:$0xff] }
  0x7f   : > { %v1053_v31 = vld [vmem:[%s1432_s7 + $0x38] sm:$0xff]   ;;  %v304_v33 = vld [vmem:[#allocation2 + $0x50] sm:$0xff]  ;;  %v295_v44 = vld [vmem:[#allocation2 + $0x8] sm:$0xff] }
  0x80   : > { %v297_v38 = vld [vmem:[#allocation2 + $0x18] sm:$0xff]  ;;  %v303_v45 = vld [vmem:[#allocation2 + $0x48] sm:$0xff]  ;;  %v300_v56 = vld [vmem:[#allocation2 + $0x30] sm:$0xff] }
  0x81   : > { %904 = vmatpush3.bf16.msra.mxu0 %v1039_v19  ;;  %942 = vmatpush3.bf16.msra.mxu1 %v1039_v19  ;;  %v305_v39 = vld [vmem:[#allocation2 + $0x58] sm:$0xff]  ;;  %v308_v57 = vld [vmem:[#allocation2 + $0x70] sm:$0xff]  ;;  %v298_v58 = vld [vmem:[#allocation2 + $0x20] sm:$0xff] }
  0x82   : > { %905 = vmatprep.subr.bf16.mxu0 %v1040_v20  ;;  %935 = vmatprep.subr.bf16.mxu1 %v1040_v20  ;;  %v306_v59 = vld [vmem:[#allocation2 + $0x60] sm:$0xff]  ;;  %v301_v62 = vld [vmem:[#allocation2 + $0x38] sm:$0xff]  ;;  %v299_v4 = vld [vmem:[#allocation2 + $0x28] sm:$0xff] }
  0x83   : > { %v309_v63 = vld [vmem:[#allocation2 + $0x78] sm:$0xff]  ;;  %v307_v5 = vld [vmem:[#allocation2 + $0x68] sm:$0xff] }
  0x85   : > { %906 = vmatpush3.bf16.msra.mxu0 %v1040_v20  ;;  %943 = vmatpush3.bf16.msra.mxu1 %v1040_v20 }
  0x86   : > { %907 = vmatprep.subr.bf16.mxu0 %v1041_v21  ;;  %936 = vmatprep.subr.bf16.mxu1 %v1041_v21 }
  0x89   : > { %908 = vmatpush3.bf16.msra.mxu0 %v1041_v21  ;;  %944 = vmatpush3.bf16.msra.mxu1 %v1041_v21 }
  0x8a   : > { %909 = vmatprep.subr.bf16.mxu0 %v1042_v22  ;;  %937 = vmatprep.subr.bf16.mxu1 %v1042_v22 }
  0x8d   : > { %910 = vmatpush3.bf16.msra.mxu0 %v1042_v22  ;;  %945 = vmatpush3.bf16.msra.mxu1 %v1042_v22 }
  0x8e   : > { %911 = vmatprep.subr.bf16.mxu0 %v1043_v23  ;;  %938 = vmatprep.subr.bf16.mxu1 %v1043_v23 }
  0x91   : > { %912 = vmatpush3.bf16.msra.mxu0 %v1043_v23  ;;  %946 = vmatpush3.bf16.msra.mxu1 %v1043_v23 }
  0x92   : > { %913 = vmatprep.subr.bf16.mxu0 %v1044_v24  ;;  %939 = vmatprep.subr.bf16.mxu1 %v1044_v24 }
  0x95   : > { %914 = vmatpush3.bf16.msra.mxu0 %v1044_v24  ;;  %947 = vmatpush3.bf16.msra.mxu1 %v1044_v24 }
  0x96   : > { %915 = vmatprep.subr.bf16.mxu0 %v1045_v25  ;;  %940 = vmatprep.subr.bf16.mxu1 %v1045_v25 }
  0x99   : > { %916 = vmatpush3.bf16.msra.mxu0 %v1045_v25  ;;  %948 = vmatpush3.bf16.msra.mxu1 %v1045_v25 }
  0x9c   : > { %918 = vmatmul.mubr.bf16.vlgmr.msra.gmra.mrb[0].mxu0 %v1048_v26  ;;  %926 = vmatmul.mubr.bf16.vlgmr.msra.gmra.mrb[0].mxu1 %v1049_v27 }
  0x9d   : > { %921 = vmatprep.mubr.bf16.mxu0 %v1050_v28  ;;  %929 = vmatprep.mubr.bf16.mxu1 %v1051_v29 }
  0xa4   : > { %922 = vmatmul.mubr.bf16.gmra.mrb[4].mxu0 %v1052_v30  ;;  %930 = vmatmul.mubr.bf16.gmra.mrb[4].mxu1 %v1053_v31 }
 0x16f   : > { %v919_v36 = vpop.f32.mrb[0].mxu0  ;;  %v927_v37 = vpop.f32.mrb[0].mxu1 }
 0x170   : > { %v521_v40 = vadd.f32 %v919_v36, %v296_v32  ;;  %v529_v41 = vadd.f32 %v927_v37, %v304_v33  ;;  %v456_v42 = vpop.f32.mrb[1].mxu0  ;;  %v488_v43 = vpop.f32.mrb[1].mxu1 }
 0x171   : > { %v519_v46 = vadd.f32 %v456_v42, %v294_v34  ;;  %v527_v47 = vadd.f32 %v488_v43, %v302_v35  ;;  %v920_v48 = vpop.f32.mrb[2].mxu0  ;;  %v928_v49 = vpop.f32.mrb[2].mxu1 }
 0x172   : > { %537 = vst [vmem:[#allocation2 + $0x10] sm:$0xff] %v521_v40  ;;  %545 = vst [vmem:[#allocation2 + $0x50] sm:$0xff] %v529_v41  ;;  %v522_v50 = vadd.f32 %v920_v48, %v297_v38  ;;  %v530_v51 = vadd.f32 %v928_v49, %v305_v39  ;;  %v459_v52 = vpop.f32.mrb[3].mxu0  ;;  %v491_v53 = vpop.f32.mrb[3].mxu1 }
 0x173   : > { %535 = vst [vmem:[#allocation2] sm:$0xff] %v519_v46  ;;  %543 = vst [vmem:[#allocation2 + $0x40] sm:$0xff] %v527_v47  ;;  %v520_v54 = vadd.f32 %v459_v52, %v295_v44  ;;  %v528_v55 = vadd.f32 %v491_v53, %v303_v45 }
 0x174   : > { %538 = vst [vmem:[#allocation2 + $0x18] sm:$0xff] %v522_v50  ;;  %546 = vst [vmem:[#allocation2 + $0x58] sm:$0xff] %v530_v51 }
 0x175   : > { %536 = vst [vmem:[#allocation2 + $0x8] sm:$0xff] %v520_v54  ;;  %544 = vst [vmem:[#allocation2 + $0x48] sm:$0xff] %v528_v55 }
 0x177   : > { %v923_v60 = vpop.f32.mrb[4].mxu0  ;;  %v931_v61 = vpop.f32.mrb[4].mxu1  ;;  %554 = sbr.rel (%p799_p11) target bundleno = 395 (0x18b), region = 52 }
 0x178   : > { %v525_v0 = vadd.f32 %v923_v60, %v300_v56  ;;  %v533_v1 = vadd.f32 %v931_v61, %v308_v57  ;;  %v472_v2 = vpop.f32.mrb[5].mxu0  ;;  %v504_v3 = vpop.f32.mrb[5].mxu1 }
 0x179   : > { %v523_v6 = vadd.f32 %v472_v2, %v298_v58  ;;  %v531_v7 = vadd.f32 %v504_v3, %v306_v59  ;;  %v924_v8 = vpop.f32.mrb[6].mxu0  ;;  %v932_v9 = vpop.f32.mrb[6].mxu1  ;;  %v557_v18 = vld [vmem:[#allocation2 + $0x10] sm:$0xff] (!%p799_p11) }
 0x17a   : > { %541 = vst [vmem:[#allocation2 + $0x30] sm:$0xff] %v525_v0  ;;  %549 = vst [vmem:[#allocation2 + $0x70] sm:$0xff] %v533_v1  ;;  %v526_v10 = vadd.f32 %v924_v8, %v301_v62  ;;  %v534_v11 = vadd.f32 %v932_v9, %v309_v63  ;;  %v475_v12 = vpop.f32.mrb[7].mxu0  ;;  %v507_v13 = vpop.f32.mrb[7].mxu1  ;;  %v555_v16 = vld [vmem:[#allocation2] sm:$0xff] (!%p799_p11)  ;;  %v573_v22 = vmax.f32 (!%p799_p11), %v557_v18, 0.0 }
 0x17b   : > { %539 = vst [vmem:[#allocation2 + $0x20] sm:$0xff] %v523_v6  ;;  %547 = vst [vmem:[#allocation2 + $0x60] sm:$0xff] %v531_v7  ;;  %v524_v14 = vadd.f32 %v475_v12, %v299_v4  ;;  %v532_v15 = vadd.f32 %v507_v13, %v307_v5  ;;  %v571_v19 = vmax.f32 (!%p799_p11), %v555_v16, 0.0  ;;  %v558_v21 = vld [vmem:[#allocation2 + $0x18] sm:$0xff] (!%p799_p11)  ;;  %v563_v30 = vld [vmem:[#allocation2 + $0x40] sm:$0xff] (!%p799_p11) }
 0x17c   : > { %542 = vst [vmem:[#allocation2 + $0x38] sm:$0xff] %v526_v10  ;;  %550 = vst [vmem:[#allocation2 + $0x78] sm:$0xff] %v534_v11  ;;  %v556_v17 = vld [vmem:[#allocation2 + $0x8] sm:$0xff] (!%p799_p11)  ;;  %v574_v25 = vmax.f32 (!%p799_p11), %v558_v21, 0.0  ;;  %v579_v35 = vmax.f32 (!%p799_p11), %v563_v30, 0.0  ;;  %v565_v36 = vld [vmem:[#allocation2 + $0x50] sm:$0xff] (!%p799_p11) }
 0x17d   : > { %540 = vst [vmem:[#allocation2 + $0x28] sm:$0xff] %v524_v14  ;;  %548 = vst [vmem:[#allocation2 + $0x68] sm:$0xff] %v532_v15  ;;  %v572_v20 = vmax.f32 (!%p799_p11), %v556_v17, 0.0  ;;  %v564_v34 = vld [vmem:[#allocation2 + $0x48] sm:$0xff] (!%p799_p11)  ;;  %v566_v37 = vld [vmem:[#allocation2 + $0x58] sm:$0xff] (!%p799_p11)  ;;  %v581_v41 = vmax.f32 (!%p799_p11), %v565_v36, 0.0 }
 0x17e   : > { %v846_v38 = vpack.c.bf16 %v574_v25, %v573_v22  ;;  %v580_v40 = vmax.f32 %v564_v34, 0.0  ;;  %v582_v46 = vmax.f32 %v566_v37, 0.0 }
 0x17f   : > { %v841_v31 = vpack.c.bf16 %v572_v20, %v571_v19 }
 0x180   : > { %878 = vst [vmem:[#allocation9 + $0x8] sm:$0xff] %v846_v38   ;;  %v861_v50 = vpack.c.bf16 %v580_v40, %v579_v35  ;;  %v866_v53 = vpack.c.bf16 %v582_v46, %v581_v41 }
 0x181   : > { %v561_v28 = vld [vmem:[#allocation2 + $0x30] sm:$0xff]  ;;  %842 = vst [vmem:[#allocation9] sm:$0xff] %v841_v31  }
 0x182   : > { %v559_v23 = vld [vmem:[#allocation2 + $0x20] sm:$0xff]  ;;  %v577_v32 = vmax.f32 %v561_v28, 0.0  ;;  %v569_v44 = vld [vmem:[#allocation2 + $0x70] sm:$0xff]  ;;  %881 = vst [vmem:[#allocation9 + $0x20] sm:$0xff] %v861_v50   ;;  %882 = vst [vmem:[#allocation9 + $0x28] sm:$0xff] %v866_v53  }
 0x183   : > { %v575_v26 = vmax.f32 %v559_v23, 0.0  ;;  %v562_v29 = vld [vmem:[#allocation2 + $0x38] sm:$0xff]  ;;  %v567_v42 = vld [vmem:[#allocation2 + $0x60] sm:$0xff]  ;;  %v585_v51 = vmax.f32 %v569_v44, 0.0 }
 0x184   : > { %v560_v24 = vld [vmem:[#allocation2 + $0x28] sm:$0xff]  ;;  %v578_v33 = vmax.f32 %v562_v29, 0.0  ;;  %v583_v47 = vmax.f32 %v567_v42, 0.0  ;;  %v570_v49 = vld [vmem:[#allocation2 + $0x78] sm:$0xff] }
 0x185   : > { %v576_v27 = vmax.f32 %v560_v24, 0.0  ;;  %v568_v43 = vld [vmem:[#allocation2 + $0x68] sm:$0xff]  ;;  %v586_v52 = vmax.f32 %v570_v49, 0.0 }
 0x186   : > { %v856_v45 = vpack.c.bf16 %v578_v33, %v577_v32  ;;  %v584_v48 = vmax.f32 %v568_v43, 0.0 }
 0x187   : > { %v851_v39 = vpack.c.bf16 %v576_v27, %v575_v26  ;;  %v876_v55 = vpack.c.bf16 %v586_v52, %v585_v51 }
 0x188   : > { %880 = vst [vmem:[#allocation9 + $0x18] sm:$0xff] %v856_v45   ;;  %v871_v54 = vpack.c.bf16 %v584_v48, %v583_v47 }
 0x189   : > { %879 = vst [vmem:[#allocation9 + $0x10] sm:$0xff] %v851_v39   ;;  %884 = vst [vmem:[#allocation9 + $0x38] sm:$0xff] %v876_v55  }
 0x18a   : > { %883 = vst [vmem:[#allocation9 + $0x30] sm:$0xff] %v871_v54  }
 0x18b PF: > { %p979_p0 = scmp.eq.s32.totalorder %s1289_s18, 2  ;;  %s1237_s15 = smov [#allocation9]  }
 0x18c   : > { %s676_s9 = sshll.u32 %s1237_s15, 4  ;;  %s677_s9 = int_to_ptr.vmem [resolvable:$true] %s676_s9 }
 0x18d   : > { %s1140_s23 = scalar_lea.vmem %s677_s9, 1024  ;;  %p1147_p2 = scmp.lt.s32.totalorder %s677_s9, %s677_s9 }
 0x18e   : > { %p1141_p3 = scmp.ne.s32.totalorder %s677_s9, %s1140_s23  ;;  %p1148_p4 = scmp.lt.s32.totalorder %s1140_s23, %s1140_s23 }
 0x190   : > { %p1142_p12 = pnand %p1141_p3, %p979_p0  ;;  %p1149_p8 = por %p1148_p4, %p1147_p2 }
 0x192   : > { %p1143_p1 = pneg %p1142_p12 }
 0x194   : > { %p1150_p13 = pnand %p1149_p8, %p1143_p1 }
 0x196   : > { %1153 = shalt.err (!%p1150_p13)
}
 0x197   : > { %s1154_s4 = scalar_lea.hbm %s1507_s3, 1024 }
 0x198   : > { %p1155_p5 = scmp.ne.s32.totalorder %s1507_s3, %s1154_s4  ;;  %p1160_p6 = scmp.lt.u32.totalorder %s1154_s4, %s1507_s3 }
 0x19a   : > { %p1156_p10 = pnand %p1155_p5, %p979_p0 }
 0x19c   : > { %p1157_p7 = pneg %p1156_p10 }
 0x19e   : > { %p1162_p9 = pnand %p1160_p6, %p1157_p7 }
 0x1a0   : > { %1165 = shalt.err (!%p1162_p9)
}
 0x1a1   : > { %s1238_s28 = smov 64   ;;  %s1239_s11 = smov 4  }
 0x1a2   : > { %960 = dma.vmem_to_hbm [thread:$0]  (%p979_p0), %s677_s9, 1024, %s1507_s3, [#allocation5], %s1238_s28, %s1238_s28, %s1239_s11  }
 0x1a3   : > { %1203 = dma.done.wait (%p979_p0), [#allocation5], 1024  }
 0x1a4   : > { %1205 = vsyncadd (%p979_p0), [#allocation5], 4294966272 }
 0x1a5 PF: > { %s18_s17 = sadd.s32 1, %s1228_s17   ;;  %s1524_s8 = smov %s1531_s12 }
 0x1a6   : > { %p15_p11 = scmp.ge.s32.totalorder %s18_s17, 5   ;;  %s1525_s12 = smov %s1212_s13 }
 0x1a7   : > { %s1526_s13 = smov %s1216_s14  ;;  %s1527_s14 = smov %s1422_s5 }
 0x1a8   : > { %s1528_s15 = smov %s1224_s16  ;;  %s1529_s16 = smov %s1524_s8 }
 0x1a9   :  { %17 = sbr.rel (!%p15_p11) target bundleno = 6 (0x6), region = 89 }
 0x1b0   :  { %692 = vsyncpa [#allocation4], 1 }
 0x1b1   :  { %694 = vsyncpa [#allocation4 + $0x1], 1 }
 0x1b2   :  { %695 = vsyncpa [#allocation7], 1 }
 0x1b3   :  { %697 = vsyncpa [#allocation7 + $0x1], 1 }
 0x1b4   :  { %698 = vsyncpa [#allocation5], 1 }
 0x1b5   :  { %700 = vsyncpa [#allocation5 + $0x1], 1 }

</bundles_post_ra>
